<compile_context>
chip_gen: v6e
topology: v6e:2x2x1
jax: 0.10.0
libtpu: 0.0.40
codegen_flags: <defaults>
</compile_context>

<pallas_src>
import jax
import jax.numpy as jnp
from jax.experimental import pallas as pl
from jax.experimental.pallas import tpu as pltpu


# Single per-generation-safe VMEM ceiling: v5e/v6e have 128 MiB physical
# (scoped default 16/32 MiB, overridden below), v7x has 64 MiB per TC -> 48 MiB
# leaves headroom everywhere.  Both the compiler limit and the tile budget are
# derived from this one constant.
VMEM_LIMIT_BYTES = 48 * 1024 * 1024


def make_focal_loss_kernel(gamma: float, alpha: float, n_total: int,
                           tile_n: int, need_mask: bool):
    gamma = float(gamma)
    alpha = float(alpha)

    def focal_kernel(logits_ref, tgt_ref, out_ref):
        # logits_ref: (TILE_N, C) native dtype in VMEM
        # tgt_ref:    (TILE_N, 1) int32       in VMEM
        # out_ref:    (1, 8, 128) float32     in VMEM (per-tile partial sum)
        x = logits_ref[...].astype(jnp.float32)              # upcast in-register
        t = tgt_ref[...]                                      # (TILE_N, 1) int32

        # numerically stable logsumexp over the class (lane) axis
        m = jnp.max(x, axis=-1, keepdims=True)                # (TILE_N, 1)
        z = x - m
        lse = jnp.log(jnp.sum(jnp.exp(z), axis=-1, keepdims=True))   # (TILE_N, 1)

        # gather z[target] without materializing the full log-softmax
        class_ids = jax.lax.broadcasted_iota(jnp.int32, z.shape, 1)   # (TILE_N, C)
        z_t = jnp.sum(jnp.where(class_ids == t, z, 0.0),
                      axis=-1, keepdims=True)                          # (TILE_N, 1)
        log_p = lse - z_t                                      # per-sample CE

        # focal re-weighting (all f32 on-chip)
        p = jnp.exp(-log_p)
        one_minus_p = jnp.maximum(1.0 - p, 0.0)                # clamp fp-noise p > 1
        if gamma == 2.0:
            focal = one_minus_p * one_minus_p                  # no float pow
        elif gamma == 1.0:
            focal = one_minus_p
        elif gamma == 0.0:
            focal = jnp.ones_like(one_minus_p)
        else:
            focal = one_minus_p ** gamma
        loss = alpha * focal * log_p                           # (TILE_N, 1)

        # mask padded rows of the ragged tail tile -- only emitted when the
        # grid actually has a ragged tail (static Python check).
        if need_mask:
            i = pl.program_id(0)
            row_ids = i * tile_n + jax.lax.broadcasted_iota(jnp.int32, loss.shape, 0)
            loss = jnp.where(row_ids < n_total, loss, 0.0)

        # per-tile partial sum, splatted across one lane-dense output block
        out_ref[...] = jnp.broadcast_to(jnp.sum(loss), (1, 8, 128)).astype(jnp.float32)

    return focal_kernel


def _sublane_align(itemsize: int) -> int:
    # sublane packing: f32 -> 8 rows, bf16 -> 16, int8/fp8 -> 32
    return max(8, 32 // max(itemsize, 1))


def _round_up(x: int, m: int) -> int:
    return -(-x // m) * m


def _choose_tile_n(c: int, itemsize: int) -> int:
    """Largest sublane-aligned row tile fitting the VMEM budget.

    Accounting (per review): lane-pad C to 128, count the double-buffered
    native-dtype logits block, the double-buffered lane-padded (TILE_N,1) int32
    targets block, and ~6 live f32/i32 (TILE_N, C_pad) temporaries
    (x, z, exp(z), iota, compare mask, select result).  ~30% headroom is kept
    below the compiler vmem limit.
    """
    c_pad = _round_up(c, 128)
    budget = int(VMEM_LIMIT_BYTES * 0.70)
    per_row = (2 * c_pad * itemsize        # logits tile, double-buffered, lane-padded
               + 2 * 128 * 4               # targets (TILE_N,1) int32, pads to 128 lanes, x2 bufs
               + 6 * c_pad * 4)            # ~6 live f32/i32 (TILE_N, C_pad) temporaries
    tile = budget // max(per_row, 1)
    align = _sublane_align(itemsize)
    tile = max((tile // align) * align, align)
    tile = min(tile, 16384)                # plenty to amortize ~0.35 us/step overhead
    return int(tile)


def focal_loss(logits, targets, *, gamma=2.0, alpha=0.25, tile_n=None):
    """logits: (N, C) float (any float dtype), targets: (N,) int class ids. Returns scalar f32."""
    n, c = logits.shape
    itemsize = jnp.dtype(logits.dtype).itemsize
    align = _sublane_align(itemsize)
    tgt2d = targets.astype(jnp.int32).reshape(n, 1)

    if tile_n is None:
        tile_n = _choose_tile_n(c, itemsize)
        if tile_n >= n:
            if n >= 2 * align:
                # VMEM budget covers all of N: still split into 2 aligned tiles so
                # v7x's two TensorCores both get work under "parallel" semantics.
                tile_n = _round_up(-(-n // 2), align)
            else:
                tile_n = n                      # too small to split: one full block
        else:
            # prefer an even tile count for the 2-TC megacore split
            num = -(-n // tile_n)
            if num > 1 and num % 2 == 1:
                tile_n = max(align, _round_up(-(-n // (num + 1)), align))
    else:
        if tile_n >= n:
            tile_n = n                          # single block == full dim (any N allowed)
        else:
            tile_n = max((int(tile_n) // align) * align, align)  # sublane-aligned

    num_tiles = -(-n // tile_n)
    need_mask = (num_tiles * tile_n != n)

    kernel = make_focal_loss_kernel(gamma, alpha, n, tile_n, need_mask)

    cost = pl.CostEstimate(
        flops=10 * n * c,
        transcendentals=n * c + 2 * n,
        bytes_accessed=n * c * itemsize + n * 4 + num_tiles * 8 * 128 * 4,
    )

    partials = pl.pallas_call(
        kernel,
        out_shape=jax.ShapeDtypeStruct((num_tiles, 8, 128), jnp.float32),
        grid=(num_tiles,),
        in_specs=[
            pl.BlockSpec((tile_n, c), lambda i: (i, 0)),   # logits tile (native dtype)
            pl.BlockSpec((tile_n, 1), lambda i: (i, 0)),   # target ids tile
        ],
        out_specs=pl.BlockSpec((1, 8, 128), lambda i: (i, 0, 0)),
        compiler_params=pltpu.CompilerParams(
            dimension_semantics=("parallel",),
            vmem_limit_bytes=VMEM_LIMIT_BYTES,
        ),
        cost_estimate=cost,
    )(logits, tgt2d)

    # tiny final reduction (num_tiles elements); mean divisor = true N
    return jnp.sum(partials[:, 0, 0]) / jnp.float32(n)


def focal_loss_ref(logits, targets, *, gamma=2.0, alpha=0.25):
    """Plain-JAX reference mirroring the PyTorch module (type='bce', weight=None)."""
    lsm = jax.nn.log_softmax(logits.astype(jnp.float32), axis=-1)
    log_p = -jnp.take_along_axis(lsm, targets[:, None].astype(jnp.int32), axis=-1)[:, 0]
    p = jnp.exp(-log_p)
    loss = alpha * (1.0 - p) ** gamma * log_p
    return jnp.mean(loss)


if __name__ == "__main__":
    # FocalLoss has no learnable parameters (weight=None by default); nothing to init.
    key = jax.random.PRNGKey(0)
    k_logits, k_tgt, k_logits2, k_tgt2 = jax.random.split(key, 4)

    N, C = 200, 32
    # bf16 logits: kernel reads the native dtype from HBM and upcasts in-register.
    logits = jax.random.normal(k_logits, (N, C), dtype=jnp.float32).astype(jnp.bfloat16)
    targets = jax.random.randint(k_tgt, (N,), 0, C, dtype=jnp.int32)

    ref = focal_loss_ref(logits, targets, gamma=2.0, alpha=0.25)

    # explicit multi-tile path with a ragged tail (200 rows, 64-row tiles -> 4 tiles)
    out_tiled = jax.block_until_ready(
        focal_loss(logits, targets, gamma=2.0, alpha=0.25, tile_n=64))
    # auto tile size (budget covers N -> split into 2 even tiles for the v7x megacore)
    out_auto = jax.block_until_ready(
        focal_loss(logits, targets, gamma=2.0, alpha=0.25))

    assert jnp.allclose(out_tiled, ref, rtol=1e-5, atol=1e-5), (out_tiled, ref)
    assert jnp.allclose(out_auto, ref, rtol=1e-5, atol=1e-5), (out_auto, ref)

    # exact-multiple path (no ragged-tail mask emitted), f32 logits
    N2, C2 = 128, 40
    logits2 = jax.random.normal(k_logits2, (N2, C2), dtype=jnp.float32)
    targets2 = jax.random.randint(k_tgt2, (N2,), 0, C2, dtype=jnp.int32)
    ref2 = focal_loss_ref(logits2, targets2, gamma=2.0, alpha=0.25)
    out2 = jax.block_until_ready(focal_loss(logits2, targets2, gamma=2.0, alpha=0.25))
    assert jnp.allclose(out2, ref2, rtol=1e-5, atol=1e-5), (out2, ref2)

    print("KERNEL_OK")
</pallas_src>

<mosaic_0001>
module attributes {stable_mosaic.version = 11 : i64} {
  func.func @focal_kernel(%arg0: i32, %arg1: memref<64x32xbf16, #tpu.memory_space<vmem>>, %arg2: memref<64x1xi32, #tpu.memory_space<vmem>>, %arg3: memref<1x8x128xf32, #tpu.memory_space<vmem>>) attributes {dimension_semantics = [#tpu.dimension_semantics<parallel>], iteration_bounds = array<i64: 4>, scalar_prefetch = 0 : i64, scratch_operands = 0 : i64, tpu.core_type = #tpu.core_type<tc>, window_params = [{transform_indices = @transform_0, window_bounds = array<i64: 64, 32>}, {transform_indices = @transform_1, window_bounds = array<i64: 64, 1>}, {transform_indices = @transform_2, window_bounds = array<i64: 1, 8, 128>}]} {
    %c0 = arith.constant 0 : index
    %c0_0 = arith.constant 0 : index
    %0 = vector.load %arg1[%c0, %c0_0] : memref<64x32xbf16, #tpu.memory_space<vmem>>, vector<64x32xbf16>
    %1 = arith.extf %0 : vector<64x32xbf16> to vector<64x32xf32>
    %c0_1 = arith.constant 0 : index
    %c0_2 = arith.constant 0 : index
    %2 = vector.load %arg2[%c0_1, %c0_2] : memref<64x1xi32, #tpu.memory_space<vmem>>, vector<64x1xi32>
    %cst = arith.constant dense<0xFF800000> : vector<64xf32>
    %3 = vector.multi_reduction <maximumf>, %1, %cst [1] : vector<64x32xf32> to vector<64xf32>
    %4 = vector.shape_cast %3 : vector<64xf32> to vector<64x1xf32>
    %5 = vector.broadcast %4 : vector<64x1xf32> to vector<64x32xf32>
    %6 = arith.subf %1, %5 : vector<64x32xf32>
    %7 = math.exp %6 : vector<64x32xf32>
    %cst_3 = arith.constant dense<0.000000e+00> : vector<64xf32>
    %8 = vector.multi_reduction <add>, %7, %cst_3 [1] : vector<64x32xf32> to vector<64xf32>
    %9 = vector.shape_cast %8 : vector<64xf32> to vector<64x1xf32>
    %10 = math.log %9 : vector<64x1xf32>
    %11 = tpu.iota {dimensions = array<i32: 1>} : vector<64x32xi32>
    %12 = vector.broadcast %2 : vector<64x1xi32> to vector<64x32xi32>
    %13 = arith.cmpi eq, %11, %12 : vector<64x32xi32>
    %cst_4 = arith.constant 0.000000e+00 : f32
    %14 = vector.broadcast %cst_4 : f32 to vector<64x32xf32>
    %15 = arith.select %13, %6, %14 : vector<64x32xi1>, vector<64x32xf32>
    %cst_5 = arith.constant dense<0.000000e+00> : vector<64xf32>
    %16 = vector.multi_reduction <add>, %15, %cst_5 [1] : vector<64x32xf32> to vector<64xf32>
    %17 = vector.shape_cast %16 : vector<64xf32> to vector<64x1xf32>
    %18 = arith.subf %10, %17 : vector<64x1xf32>
    %cst_6 = arith.constant 0.000000e+00 : f32
    %19 = vector.broadcast %cst_6 : f32 to vector<64x1xf32>
    %20 = arith.subf %19, %18 : vector<64x1xf32>
    %21 = math.exp %20 : vector<64x1xf32>
    %cst_7 = arith.constant 1.000000e+00 : f32
    %22 = vector.broadcast %cst_7 : f32 to vector<64x1xf32>
    %23 = arith.subf %22, %21 : vector<64x1xf32>
    %cst_8 = arith.constant 0.000000e+00 : f32
    %24 = vector.broadcast %cst_8 : f32 to vector<64x1xf32>
    %25 = arith.maximumf %23, %24 : vector<64x1xf32>
    %26 = arith.mulf %25, %25 : vector<64x1xf32>
    %cst_9 = arith.constant 2.500000e-01 : f32
    %27 = vector.broadcast %cst_9 : f32 to vector<64x1xf32>
    %28 = arith.mulf %27, %26 : vector<64x1xf32>
    %29 = arith.mulf %28, %18 : vector<64x1xf32>
    %c64_i32 = arith.constant 64 : i32
    %30 = arith.muli %arg0, %c64_i32 : i32
    %31 = tpu.iota {dimensions = array<i32: 0>} : vector<64x1xi32>
    %32 = vector.broadcast %30 : i32 to vector<64x1xi32>
    %33 = arith.addi %32, %31 : vector<64x1xi32>
    %c200_i32 = arith.constant 200 : i32
    %34 = vector.broadcast %c200_i32 : i32 to vector<64x1xi32>
    %35 = arith.cmpi slt, %33, %34 : vector<64x1xi32>
    %cst_10 = arith.constant 0.000000e+00 : f32
    %36 = vector.broadcast %cst_10 : f32 to vector<64x1xf32>
    %37 = arith.select %35, %29, %36 : vector<64x1xi1>, vector<64x1xf32>
    %38 = vector.shape_cast %37 : vector<64x1xf32> to vector<1x64x1xf32>
    %cst_11 = arith.constant dense<0.000000e+00> : vector<1xf32>
    %39 = vector.multi_reduction <add>, %38, %cst_11 [1, 2] : vector<1x64x1xf32> to vector<1xf32>
    %40 = vector.shape_cast %39 : vector<1xf32> to vector<1x1x1xf32>
    %41 = vector.extract %40[0, 0, 0] : f32 from vector<1x1x1xf32>
    %42 = vector.broadcast %41 : f32 to vector<1x8x128xf32>
    %c0_12 = arith.constant 0 : index
    %c0_13 = arith.constant 0 : index
    %c0_14 = arith.constant 0 : index
    %43 = vector.load %arg3[%c0_12, %c0_13, %c0_14] : memref<1x8x128xf32, #tpu.memory_space<vmem>>, vector<1x8x128xf32>
    tpu.vector_store %arg3[%c0_12, %c0_13, %c0_14], %42 {strides = array<i32>} : memref<1x8x128xf32, #tpu.memory_space<vmem>>, vector<1x8x128xf32>,
    return
  }
  func.func @transform_0(%arg0: i32) -> (i32, i32) {
    %c0_i32 = arith.constant 0 : i32
    %c0_i32_0 = arith.constant 0 : i32
    return %arg0, %c0_i32 : i32, i32
  }
  func.func @transform_1(%arg0: i32) -> (i32, i32) {
    %c0_i32 = arith.constant 0 : i32
    %c0_i32_0 = arith.constant 0 : i32
    return %arg0, %c0_i32 : i32, i32
  }
  func.func @transform_2(%arg0: i32) -> (i32, i32, i32) {
    %c0_i32 = arith.constant 0 : i32
    %c0_i32_0 = arith.constant 0 : i32
    %c0_i32_1 = arith.constant 0 : i32
    return %arg0, %c0_i32, %c0_i32_0 : i32, i32, i32
  }
}

</mosaic_0001>

<bundles_post_ra>
// kernel: tpu_custom_call.1
= control target key start
LH: loop header
LB: loop body
LE: loop exit
PB: predicated region body
PF: predicated region fallthrough
CT: control target
= control target key end

     0   :  { %7 = vsyncpa [#allocation3], 0  ;;  %s1026_s0 = inlined_call_operand.vmem [shape: bf16[200,32], index: 0, kind: input, shape index: {}]   ;;  %s1027_s1 = inlined_call_operand.vmem [shape: s32[200,1], index: 1, kind: input, shape index: {}]   ;;  %s1028_s2 = inlined_call_operand.hbm [shape: f32[4,8,128], index: 2, kind: output, shape index: {}]  }
   0x1   :  { %9 = vsyncpa [#allocation3 + $0x1], 0  ;;  %s808_s9 = smov 0   ;;  %s810_s10 = smov 0  }
   0x2   :  { %s812_s11 = smov 0   ;;  %s814_s12 = smov 0  }
   0x3 LB: > { %s829_s13 = sadd.s32 4294967295, %s789_s12   ;;  %s604_s14 = sadd.s32 4294967294, %s789_s12   ;;  %s789_s12 = sphi %s814_s12, %s1034_s12   ;;  %s785_s11 = sphi %s812_s11, %s1033_s11   ;;  %s781_s10 = sphi %s810_s10, %s1032_s10   ;;  %s777_s9 = sphi %s808_s9, %s1031_s9  }
   0x4   : > { %s833_s15 = sadd.s32 1, %s789_s12   ;;  %s74_s16 = sadd.s32 1, %s785_s11 }
   0x5   : > { %s71_s17 = ssub.s32 %s789_s12, %s833_s15  ;;  %p84_p0 = scmp.ne.s32.totalorder %s785_s11, %s781_s10 }
   0x6   : > { %p72_p1 = scmp.eq.s32.totalorder %s71_s17, 0  ;;  %p85_p2 = scmp.eq.s32.totalorder %s829_s13, 3 }
   0x7   : > { %p90_p3 = scmp.ne.s32.totalorder %s781_s10, %s777_s9  ;;  %p91_p4 = scmp.eq.s32.totalorder %s604_s14, 3 }
   0x8   : > { %s844_s18 = scalar_select %p72_p1, %s785_s11, %s74_s16  }
   0x9   : > { %p846_p5 = por %p85_p2, %p84_p0  ;;  %p850_p6 = por %p91_p4, %p90_p3 }
   0xa   : > { %p607_p7 = scmp.ge.s32.totalorder %s789_s12, 1  ;;  %p143_p8 = scmp.lt.s32.totalorder %s789_s12, 5 }
   0xc   : > { %p144_p9 = pnand %p607_p7, %p143_p8 }
   0xd   : > { %s609_s21 = sshll.u32 (!%p144_p9), %s829_s13, 3  ;;  %s613_s30 = sshll.u32 (!%p144_p9), %s829_s13, 6 }
   0xe   : > { %147 = sbr.rel (%p144_p9) target bundleno = 604 (0x25c), region = 28  ;;  %p183_p10 = scmp.lt.s32.totalorder (!%p144_p9), %s609_s21, 24 }
   0xf   : > { %s175_s3 = sand.u32 (!%p144_p9), 1, %s781_s10   ;;  %s615_s7 = sshll.u32 (!%p144_p9), %s829_s13, 7 }
  0x10   : > { %s608_s4 = sshll.u32 (!%p144_p9), %s175_s3, 3  ;;  %s531_s17 = scalar_lea.hbm (!%p144_p9), %s1028_s2, %s615_s7 }
  0x11   : > { %s177_s5 = scalar_lea.vmem (!%p144_p9), [#allocation2], %s608_s4  ;;  %s792_s23 = smov (!%p144_p9), [#allocation2]  }
  0x12   : > { %s533_s6 = sshll.u32 (!%p144_p9), %s177_s5, 4  ;;  %s733_s13 = sshll.u32 (!%p144_p9), %s792_s23, 4  ;;  %s988_s6 = int_to_ptr.vmem [resolvable:$true] %s533_s6  ;;  %s734_s13 = int_to_ptr.vmem [resolvable:$false] %s733_s13 }
  0x13   : > { %v791_v0 = vmov 0   ;;  %s1036_s21 = smov (!%p183_p10, %s609_s21), 24  ;;  %vm230_vm0 = vcmask 261120   ;;  %v319_v58 = vlaneseq  ;;  %vm492_vm9 = vcmask 7168   ;;  %s735_s24 = scalar_lea.vmem %s734_s13, 256 }
  0x14   : > { %680 = vset.pattern.permute.xlu1 %v791_v0  ;;  %679 = vset.pattern.permute.xlu0 %v791_v0  ;;  %s610_s22 = sshll.u32 %s1036_s21, 2  ;;  %s612_s26 = sshll.u32 %s1036_s21, 3 }
  0x15   : > { %s186_s25 = scalar_lea.vmem %s1026_s0, %s610_s22  ;;  %s200_s29 = scalar_lea.vmem %s1027_s1, %s612_s26 }
  0x16   : > { %v634_v1 = vld [vmem:[%s186_s25 + $0x8] sm:$0xff]   ;;  %v619_v2 = vld [vmem:[%s186_s25] sm:$0xff]   ;;  %v635_v7 = vld [vmem:[%s186_s25 + $0x10] sm:$0xff]   ;;  %s520_s21 = scalar_lea.sflag [#allocation3], %s175_s3  ;;  %s729_s22 = scalar_lea.vmem %s988_s6, 128 }
  0x17   : > { %v624_v3 = vunpack.c.l.bf16 %v634_v1  ;;  %v620_v4 = vunpack.c.l.bf16 %v619_v2  ;;  %v625_v5 = vunpack.c.h.bf16 %v634_v1  ;;  %v621_v6 = vunpack.c.h.bf16 %v619_v2  ;;  %v636_v14 = vld [vmem:[%s186_s25 + $0x18] sm:$0xff]   ;;  %v223_v21 = vld [vmem:[%s200_s29 + $0x8] sm:$0xff]  ;;  %v224_v22 = vld [vmem:[%s200_s29 + $0x10] sm:$0xff]  ;;  %p730_p11 = scmp.ne.s32.totalorder %s988_s6, %s729_s22  ;;  %p736_p0 = scmp.lt.s32.totalorder %s988_s6, %s734_s13 }
  0x18   : > { %v629_v12 = vunpack.c.h.bf16 %v635_v7  ;;  %v628_v13 = vunpack.c.l.bf16 %v635_v7  ;;  %v633_v17 = vunpack.c.h.bf16 %v636_v14  ;;  %v632_v18 = vunpack.c.l.bf16 %v636_v14  ;;  %v222_v23 = vld [vmem:[%s200_s29] sm:$0xff]  ;;  %v225_v24 = vld [vmem:[%s200_s29 + $0x18] sm:$0xff]  ;;  %v227_v26 = vld [vmem:[%s200_s29 + $0x28] sm:$0xff]  ;;  %p737_p1 = scmp.lt.s32.totalorder %s735_s24, %s729_s22 }
  0x19   : > { %v237_v8 = vsel %vm230_vm0, %v624_v3, -inf  ;;  %v231_v9 = vsel %vm230_vm0, %v620_v4, -inf  ;;  %v240_v10 = vsel %vm230_vm0, %v625_v5, -inf  ;;  %v234_v11 = vsel %vm230_vm0, %v621_v6, -inf  ;;  %v226_v25 = vld [vmem:[%s200_s29 + $0x20] sm:$0xff]  ;;  %v228_v27 = vld [vmem:[%s200_s29 + $0x30] sm:$0xff]  ;;  %p731_p12 = pnand %p730_p11, %p846_p5 }
  0x1a   : > { %238 = vmax.xlane.f32.xlu1 %v237_v8  ;;  %232 = vmax.xlane.f32.xlu0 %v231_v9  ;;  %v246_v15 = vsel %vm230_vm0, %v629_v12, -inf  ;;  %v243_v16 = vsel %vm230_vm0, %v628_v13, -inf  ;;  %v252_v19 = vsel %vm230_vm0, %v633_v17, -inf  ;;  %v249_v20 = vsel %vm230_vm0, %v632_v18, -inf  ;;  %v229_v28 = vld [vmem:[%s200_s29 + $0x38] sm:$0xff]  ;;  %p738_p2 = por %p737_p1, %p736_p0 }
  0x1b   : > { %v320_v1 = vand.u32 127, %v319_v58  ;;  %p732_p13 = pneg %p731_p12 }
  0x1d   : > { %p739_p3 = pnand %p738_p2, %p732_p13 }
  0x1e   : > { %241 = vmax.xlane.f32.xlu1 %v240_v10  ;;  %235 = vmax.xlane.f32.xlu0 %v234_v11 }
  0x22   : > { %247 = vmax.xlane.f32.xlu1 %v246_v15  ;;  %244 = vmax.xlane.f32.xlu0 %v243_v16 }
  0x26   : > { %253 = vmax.xlane.f32.xlu1 %v252_v19  ;;  %250 = vmax.xlane.f32.xlu0 %v249_v20 }
  0x37   : > { %325 = vperm.xlu1 %680, %v223_v21  }
  0x3b   : > { %328 = vperm.xlu1 %680, %v224_v22  }
  0x3c   : > { %322 = vperm.xlu0 %679, %v222_v23  }
  0x3f   : > { %331 = vperm.xlu1 %680, %v225_v24  }
  0x43   : > { %334 = vperm.xlu1 %680, %v226_v25  }
  0x47   : > { %337 = vperm.xlu1 %680, %v227_v26  }
  0x4b   : > { %340 = vperm.xlu1 %680, %v228_v27  }
  0x4f   : > { %343 = vperm.xlu1 %680, %v229_v28  }
  0xa3   : > { %v239_v29 = vpop.xlane.xlu1 %238  ;;  %v233_v30 = vpop.xlane.xlu0 %232 }
  0xa4   : > { %v875_v31 = vsub.f32 %v620_v4, %v233_v30  ;;  %v878_v33 = vsub.f32 %v624_v3, %v239_v29 }
  0xa6   : > { %v263_v32 = vmul.f32 1.442695, %v875_v31  ;;  %v267_v40 = vmul.f32 1.442695, %v878_v33 }
  0xa7   : > { %v242_v34 = vpop.xlane.xlu1 %241  ;;  %v236_v35 = vpop.xlane.xlu0 %235 }
  0xa8   : > { %v880_v36 = vsub.f32 %v625_v5, %v242_v34  ;;  %v256_v37 = vsub.f32 %v621_v6, %v236_v35  ;;  %681 = vpow2.f32 %v263_v32 }
  0xaa   : > { %v269_v38 = vmul.f32 1.442695, %v880_v36  ;;  %v265_v39 = vmul.f32 1.442695, %v256_v37 }
  0xab   : > { %v248_v41 = vpop.xlane.xlu1 %247  ;;  %v245_v42 = vpop.xlane.xlu0 %244 }
  0xac   : > { %683 = vpow2.f32 %v269_v38  ;;  %v884_v43 = vsub.f32 %v629_v12, %v248_v41  ;;  %v886_v44 = vsub.f32 %v628_v13, %v245_v42 }
  0xad   : > { %685 = vpow2.f32 %v265_v39 }
  0xae   : > { %v273_v45 = vmul.f32 1.442695, %v884_v43  ;;  %v271_v46 = vmul.f32 1.442695, %v886_v44  ;;  %687 = vpow2.f32 %v267_v40 }
  0xaf   : > { %v254_v47 = vpop.xlane.xlu1 %253  ;;  %v251_v48 = vpop.xlane.xlu0 %250 }
  0xb0   : > { %689 = vpow2.f32 %v273_v45  ;;  %v890_v49 = vsub.f32 %v633_v17, %v254_v47  ;;  %v892_v50 = vsub.f32 %v632_v18, %v251_v48 }
  0xb1   : > { %691 = vpow2.f32 %v271_v46 }
  0xb2   : > { %v277_v51 = vmul.f32 1.442695, %v890_v49  ;;  %v275_v52 = vmul.f32 1.442695, %v892_v50 }
  0xb3   : > { %v326_v53 = vpop.permute.xlu1 %325 }
  0xb4   : > { %693 = vpow2.f32 %v277_v51  ;;  %vm346_vm1 = vcmp.eq.s32.totalorder %v320_v1, %v326_v53 }
  0xb5   : > { %695 = vpow2.f32 %v275_v52  ;;  %v682_v54 = vpop.eup %681  ;;  %v354_v12 = vsel %vm346_vm1, %v256_v37, 0.0 }
  0xb6   : > { %v279_v56 = vsel %vm230_vm0, %v682_v54, 0.0  ;;  %v364_v15 = vsel %vm230_vm0, %v354_v12, 0.0 }
  0xb7   : > { %v329_v55 = vpop.permute.xlu1 %328  ;;  %280 = vadd.xlane.f32.xlu1 %v279_v56  ;;  %v323_v9 = vpop.permute.xlu0 %322 }
  0xb8   : > { %vm345_vm2 = vcmp.eq.s32.totalorder %v320_v1, %v323_v9  ;;  %vm347_vm4 = vcmp.eq.s32.totalorder %v320_v1, %v329_v55 }
  0xb9   : > { %v684_v57 = vpop.eup %683  ;;  %v353_v17 = vsel %vm345_vm2, %v875_v31, 0.0  ;;  %v355_v22 = vsel %vm347_vm4, %v878_v33, 0.0 }
  0xba   : > { %v686_v59 = vpop.eup %685  ;;  %v288_v60 = vsel %vm230_vm0, %v684_v57, 0.0  ;;  %v361_v20 = vsel %vm230_vm0, %v353_v17, 0.0  ;;  %v367_v24 = vsel %vm230_vm0, %v355_v22, 0.0 }
  0xbb   : > { %v332_v61 = vpop.permute.xlu1 %331  ;;  %v282_v62 = vsel %vm230_vm0, %v686_v59, 0.0  ;;  %v688_v63 = vpop.eup %687  ;;  %289 = vadd.xlane.f32.xlu1 %v288_v60 }
  0xbc   : > { %283 = vadd.xlane.f32.xlu0 %v282_v62  ;;  %v285_v5 = vsel %vm230_vm0, %v688_v63, 0.0  ;;  %vm348_vm3 = vcmp.eq.s32.totalorder %v320_v1, %v332_v61 }
  0xbd   : > { %v690_v0 = vpop.eup %689  ;;  %v356_v16 = vsel %vm348_vm3, %v880_v36, 0.0 }
  0xbe   : > { %v692_v2 = vpop.eup %691  ;;  %v294_v3 = vsel %vm230_vm0, %v690_v0, 0.0  ;;  %v370_v19 = vsel %vm230_vm0, %v356_v16, 0.0 }
  0xbf   : > { %v335_v4 = vpop.permute.xlu1 %334  ;;  %295 = vadd.xlane.f32.xlu1 %v294_v3  ;;  %v291_v7 = vsel %vm230_vm0, %v692_v2, 0.0 }
  0xc0   : > { %286 = vadd.xlane.f32.xlu0 %v285_v5  ;;  %vm349_vm6 = vcmp.eq.s32.totalorder %v320_v1, %v335_v4 }
  0xc1   : > { %v694_v6 = vpop.eup %693  ;;  %v357_v26 = vsel %vm349_vm6, %v886_v44, 0.0 }
  0xc2   : > { %v696_v8 = vpop.eup %695  ;;  %v300_v10 = vsel %vm230_vm0, %v694_v6, 0.0  ;;  %v373_v28 = vsel %vm230_vm0, %v357_v26, 0.0 }
  0xc3   : > { %v338_v11 = vpop.permute.xlu1 %337  ;;  %301 = vadd.xlane.f32.xlu1 %v300_v10  ;;  %v297_v13 = vsel %vm230_vm0, %v696_v8, 0.0 }
  0xc4   : > { %292 = vadd.xlane.f32.xlu0 %v291_v7  ;;  %vm350_vm5 = vcmp.eq.s32.totalorder %v320_v1, %v338_v11 }
  0xc5   : > { %v358_v21 = vsel %vm350_vm5, %v884_v43, 0.0 }
  0xc6   : > { %v376_v23 = vsel %vm230_vm0, %v358_v21, 0.0  ;;  %v944_v21 = vshrl.u32 %v319_v58, 7 }
  0xc7   : > { %v341_v14 = vpop.permute.xlu1 %340  ;;  %365 = vadd.xlane.f32.xlu1 %v364_v15 }
  0xc8   : > { %298 = vadd.xlane.f32.xlu0 %v297_v13  ;;  %vm351_vm8 = vcmp.eq.s32.totalorder %v320_v1, %v341_v14  ;;  %v462_v26 = vadd.s32 24, %v944_v21  ;;  %v461_v58 = vadd.s32 16, %v944_v21 }
  0xc9   : > { %v359_v29 = vsel %vm351_vm8, %v892_v50, 0.0 }
  0xca   : > { %v379_v30 = vsel %vm230_vm0, %v359_v29, 0.0 }
  0xcb   : > { %v344_v18 = vpop.permute.xlu1 %343  ;;  %371 = vadd.xlane.f32.xlu1 %v370_v19 }
  0xcc   : > { %362 = vadd.xlane.f32.xlu0 %v361_v20  ;;  %vm352_vm7 = vcmp.eq.s32.totalorder %v320_v1, %v344_v18 }
  0xcd   : > { %v360_v25 = vsel %vm352_vm7, %v890_v49, 0.0 }
  0xce   : > { %v382_v27 = vsel %vm230_vm0, %v360_v25, 0.0  ;;  %v460_v25 = vadd.s32 8, %v944_v21 }
  0xcf   : > { %377 = vadd.xlane.f32.xlu1 %v376_v23 }
  0xd0   : > { %368 = vadd.xlane.f32.xlu0 %v367_v24 }
  0xd3   : > { %383 = vadd.xlane.f32.xlu1 %v382_v27  ;;  %v950_v27 = vstv %s613_s30 }
  0xd4   : > { %374 = vadd.xlane.f32.xlu0 %v373_v28 }
  0xd8   : > { %380 = vadd.xlane.f32.xlu0 %v379_v30 }
 0x140   : > { %v281_v31 = vpop.xlane.xlu1 %280 }
 0x141   : > { %697 = vlog2.f32 %v281_v31 }
 0x144   : > { %v290_v32 = vpop.xlane.xlu1 %289 }
 0x145   : > { %v284_v33 = vpop.xlane.xlu0 %283  ;;  %699 = vlog2.f32 %v290_v32  ;;  %v469_v32 = vadd.s32 %v950_v27, %v460_v25 }
 0x146   : > { %701 = vlog2.f32 %v284_v33 }
 0x147   : > { %vm477_vm10 = vcmp.lt.s32.totalorder %v469_v32, 200 }
 0x148   : > { %v296_v34 = vpop.xlane.xlu1 %295 }
 0x149   : > { %v287_v35 = vpop.xlane.xlu0 %286  ;;  %703 = vlog2.f32 %v296_v34  ;;  %v471_v34 = vadd.s32 %v950_v27, %v462_v26 }
 0x14a   : > { %705 = vlog2.f32 %v287_v35 }
 0x14b   : > { %vm479_vm11 = vcmp.lt.s32.totalorder %v471_v34, 200 }
 0x14c   : > { %v302_v36 = vpop.xlane.xlu1 %301 }
 0x14d   : > { %v293_v37 = vpop.xlane.xlu0 %292  ;;  %707 = vlog2.f32 %v302_v36  ;;  %v468_v36 = vadd.s32 %v950_v27, %v944_v21 }
 0x14e   : > { %709 = vlog2.f32 %v293_v37  ;;  %v698_v38 = vpop.eup %697 }
 0x14f   : > { %v304_v44 = vmul.f32 0.6931472, %v698_v38  ;;  %vm476_vm12 = vcmp.lt.s32.totalorder %v468_v36, 200 }
 0x150   : > { %v366_v39 = vpop.xlane.xlu1 %365 }
 0x151   : > { %v299_v40 = vpop.xlane.xlu0 %298 }
 0x152   : > { %711 = vlog2.f32 %v299_v40  ;;  %v700_v41 = vpop.eup %699  ;;  %v464_v40 = vadd.s32 40, %v944_v21 }
 0x153   : > { %v702_v42 = vpop.eup %701  ;;  %v310_v43 = vmul.f32 0.6931472, %v700_v41 }
 0x154   : > { %v306_v45 = vmul.f32 0.6931472, %v702_v42  ;;  %v372_v46 = vpop.xlane.xlu1 %371 }
 0x155   : > { %v363_v47 = vpop.xlane.xlu0 %362  ;;  %v920_v48 = vsub.f32 %v310_v43, %v372_v46 }
 0x156   : > { %v922_v49 = vsub.f32 %v304_v44, %v363_v47  ;;  %v704_v50 = vpop.eup %703  ;;  %v924_v51 = vsub.f32 %v306_v45, %v366_v39  ;;  %v470_v45 = vadd.s32 %v950_v27, %v461_v58 }
 0x157   : > { %v706_v52 = vpop.eup %705  ;;  %v396_v53 = vsub.f32 0.0, %v920_v48  ;;  %v314_v55 = vmul.f32 0.6931472, %v704_v50 }
 0x158   : > { %v393_v54 = vsub.f32 0.0, %v922_v49  ;;  %v394_v56 = vsub.f32 0.0, %v924_v51  ;;  %v378_v57 = vpop.xlane.xlu1 %377  ;;  %v308_v59 = vmul.f32 0.6931472, %v706_v52  ;;  %vm478_vm13 = vcmp.lt.s32.totalorder %v470_v45, 200 }
 0x159   : > { %v369_v60 = vpop.xlane.xlu0 %368  ;;  %v407_v61 = vmul.f32 1.442695, %v396_v53  ;;  %v929_v63 = vsub.f32 %v314_v55, %v378_v57 }
 0x15a   : > { %v401_v62 = vmul.f32 1.442695, %v393_v54  ;;  %v708_v0 = vpop.eup %707  ;;  %v403_v1 = vmul.f32 1.442695, %v394_v56  ;;  %v931_v2 = vsub.f32 %v308_v59, %v369_v60  ;;  %v473_v56 = vadd.s32 %v950_v27, %v464_v40 }
 0x15b   : > { %v710_v3 = vpop.eup %709  ;;  %713 = vpow2.f32 %v407_v61  ;;  %v398_v4 = vsub.f32 0.0, %v929_v63  ;;  %v318_v5 = vmul.f32 0.6931472, %v708_v0  ;;  %v463_v59 = vadd.s32 32, %v944_v21 }
 0x15c   : > { %715 = vpow2.f32 %v403_v1  ;;  %v395_v6 = vsub.f32 0.0, %v931_v2  ;;  %v384_v7 = vpop.xlane.xlu1 %383  ;;  %v312_v8 = vmul.f32 0.6931472, %v710_v3  ;;  %vm481_vm14 = vcmp.lt.s32.totalorder %v473_v56, 200 }
 0x15d   : > { %v375_v9 = vpop.xlane.xlu0 %374  ;;  %717 = vpow2.f32 %v401_v62  ;;  %v411_v10 = vmul.f32 1.442695, %v398_v4  ;;  %v935_v11 = vsub.f32 %v318_v5, %v384_v7  ;;  %v466_v5 = vadd.s32 56, %v944_v21 }
 0x15e   : > { %v405_v13 = vmul.f32 1.442695, %v395_v6  ;;  %v937_v14 = vsub.f32 %v312_v8, %v375_v9 }
 0x15f   : > { %v712_v12 = vpop.eup %711  ;;  %719 = vpow2.f32 %v411_v10  ;;  %v400_v15 = vsub.f32 0.0, %v935_v11 }
 0x160   : > { %v316_v16 = vmul.f32 0.6931472, %v712_v12  ;;  %721 = vpow2.f32 %v405_v13  ;;  %v397_v17 = vsub.f32 0.0, %v937_v14 }
 0x161   : > { %v381_v18 = vpop.xlane.xlu0 %380  ;;  %v415_v19 = vmul.f32 1.442695, %v400_v15  ;;  %v472_v15 = vadd.s32 %v950_v27, %v463_v59 }
 0x162   : > { %v941_v20 = vsub.f32 %v316_v16, %v381_v18  ;;  %v409_v22 = vmul.f32 1.442695, %v397_v17 }
 0x163   : > { %723 = vpow2.f32 %v415_v19  ;;  %v465_v19 = vadd.s32 48, %v944_v21  ;;  %vm480_vm15 = vcmp.lt.s32.totalorder %v472_v15, 200 }
 0x164   : > { %v399_v23 = vsub.f32 0.0, %v941_v20  ;;  %725 = vpow2.f32 %v409_v22 }
 0x165   : > { %v474_v21 = vadd.s32 %v950_v27, %v465_v19 }
 0x166   : > { %v413_v24 = vmul.f32 1.442695, %v399_v23 }
 0x167   : > { %vm482_vm0 = vcmp.lt.s32.totalorder %v474_v21, 200 }
 0x168   : > { %727 = vpow2.f32 %v413_v24  ;;  %v714_v28 = vpop.eup %713 }
 0x169   : > { %v716_v29 = vpop.eup %715  ;;  %v420_v30 = vsub.f32 1.0, %v714_v28 }
 0x16a   : > { %v718_v31 = vpop.eup %717  ;;  %v418_v33 = vsub.f32 1.0, %v716_v29 }
 0x16b   : > { %v428_v35 = vmax.f32 %v420_v30, 0.0  ;;  %v417_v37 = vsub.f32 1.0, %v718_v31 }
 0x16c   : > { %v720_v38 = vpop.eup %719  ;;  %v426_v39 = vmax.f32 %v418_v33, 0.0 }
 0x16d   : > { %v722_v41 = vpop.eup %721  ;;  %v436_v42 = vmul.f32 %v428_v35, %v428_v35  ;;  %v425_v43 = vmax.f32 %v417_v37, 0.0  ;;  %v422_v44 = vsub.f32 1.0, %v720_v38 }
 0x16e   : > { %v434_v46 = vmul.f32 %v426_v39, %v426_v39  ;;  %v419_v47 = vsub.f32 1.0, %v722_v41 }
 0x16f   : > { %v444_v50 = vmul.f32 0.25, %v436_v42  ;;  %v433_v52 = vmul.f32 %v425_v43, %v425_v43  ;;  %v430_v53 = vmax.f32 %v422_v44, 0.0 }
 0x170   : > { %v724_v54 = vpop.eup %723  ;;  %v442_v55 = vmul.f32 0.25, %v434_v46  ;;  %v427_v57 = vmax.f32 %v419_v47, 0.0 }
 0x171   : > { %v726_v60 = vpop.eup %725  ;;  %v441_v61 = vmul.f32 0.25, %v433_v52  ;;  %v438_v62 = vmul.f32 %v430_v53, %v430_v53  ;;  %v424_v0 = vsub.f32 1.0, %v724_v54  ;;  %v452_v6 = vmul.f32 %v444_v50, %v920_v48 }
 0x172   : > { %v450_v1 = vmul.f32 %v442_v55, %v924_v51  ;;  %v435_v3 = vmul.f32 %v427_v57, %v427_v57  ;;  %v421_v4 = vsub.f32 1.0, %v726_v60 }
 0x173   : > { %v449_v7 = vmul.f32 %v441_v61, %v922_v49  ;;  %v446_v8 = vmul.f32 0.25, %v438_v62  ;;  %v432_v9 = vmax.f32 %v424_v0, 0.0  ;;  %v487_v24 = vsel %vm479_vm11, %v452_v6, 0.0 }
 0x174   : > { %v485_v12 = vsel %vm477_vm10, %v450_v1, 0.0  ;;  %v443_v13 = vmul.f32 0.25, %v435_v3  ;;  %v429_v16 = vmax.f32 %v421_v4, 0.0  ;;  %v498_v35 = vsel %vm492_vm9, %v487_v24, 0.0 }
 0x175   : > { %v728_v10 = vpop.eup %727  ;;  %v494_v17 = vsel %vm492_vm9, %v485_v12, 0.0  ;;  %v484_v51 = vsel %vm476_vm12, %v449_v7, 0.0  ;;  %v440_v18 = vmul.f32 %v432_v9, %v432_v9  ;;  %v454_v26 = vmul.f32 %v446_v8, %v929_v63 }
 0x176   : > { %v493_v48 = vsel %vm492_vm9, %v484_v51, 0.0  ;;  %v451_v49 = vmul.f32 %v443_v13, %v931_v2  ;;  %v437_v22 = vmul.f32 %v429_v16, %v429_v16  ;;  %v423_v23 = vsub.f32 1.0, %v728_v10 }
 0x177   : > { %v495_v25 = vadd.f32 %v494_v17, %v493_v48  ;;  %v448_v29 = vmul.f32 0.25, %v440_v18  ;;  %v475_v2 = vadd.s32 %v950_v27, %v466_v5  ;;  %v489_v36 = vsel %vm481_vm14, %v454_v26, 0.0 }
 0x178   : > { %v486_v28 = vsel %vm478_vm13, %v451_v49, 0.0  ;;  %v445_v30 = vmul.f32 0.25, %v437_v22  ;;  %v431_v58 = vmax.f32 %v423_v23, 0.0  ;;  %v502_v27 = vsel %vm492_vm9, %v489_v36, 0.0 }
 0x179   : > { %v496_v31 = vsel %vm492_vm9, %v486_v28, 0.0  ;;  %v456_v63 = vmul.f32 %v448_v29, %v935_v11  ;;  %vm483_vm1 = vcmp.lt.s32.totalorder %v475_v2, 200 }
 0x17a   : > { %v497_v32 = vadd.f32 %v496_v31, %v495_v25  ;;  %v453_v33 = vmul.f32 %v445_v30, %v937_v14  ;;  %v439_v34 = vmul.f32 %v431_v58, %v431_v58 }
 0x17b   : > { %v491_v14 = vsel %vm483_vm1, %v456_v63, 0.0 }
 0x17c   : > { %v499_v37 = vadd.f32 %v498_v35, %v497_v32  ;;  %v488_v38 = vsel %vm480_vm15, %v453_v33, 0.0  ;;  %v447_v39 = vmul.f32 0.25, %v439_v34  ;;  %v506_v11 = vsel %vm492_vm9, %v491_v14, 0.0 }
 0x17d   : > { %v500_v40 = vsel %vm492_vm9, %v488_v38, 0.0 }
 0x17e   : > { %v501_v41 = vadd.f32 %v500_v40, %v499_v37  ;;  %v455_v42 = vmul.f32 %v447_v39, %v941_v20 }
 0x180   : > { %v490_v43 = vsel %vm482_vm0, %v455_v42, 0.0  ;;  %v503_v44 = vadd.f32 %v502_v27, %v501_v41 }
 0x181   : > { %v504_v45 = vsel %vm492_vm9, %v490_v43, 0.0 }
 0x182   : > { %v505_v46 = vadd.f32 %v504_v45, %v503_v44 }
 0x184   : > { %v507_v47 = vadd.f32 %v506_v11, %v505_v46 }
 0x186   : > { %508 = vadd.xlane.f32.xlu0 %v507_v47 }
 0x20f   : > { %v509_v50 = vpop.xlane.xlu0 %508 }
 0x210   : > { %v510_v52 = vrot.slane %v509_v50, 4 }
 0x212   : > { %v511_v53 = vadd.f32 %v510_v52, %v509_v50 }
 0x214   : > { %v512_v54 = vrot.slane %v511_v53, 2 }
 0x216   : > { %v513_v55 = vadd.f32 %v512_v54, %v511_v53 }
 0x218   : > { %v514_v20 = vrot.slane %v513_v55, 1 }
 0x21a   : > { %v515_v56 = vadd.f32 %v514_v20, %v513_v55 }
 0x21c   : > { %637 = vpush %v515_v56 }
 0x24d   : > { %s638_s8 = spop %637 }
 0x24e   : > { %v517_v57 = vstv %s638_s8 }
 0x24f   : > { %518 = vst [vmem:[%s177_s5] sm:$0xff] %v517_v57 }
 0x250   : > { %742 = shalt.err (!%p739_p3)
}
 0x251   : > { %s743_s25 = scalar_lea.hbm %s531_s17, 128  ;;  %s747_s28 = scalar_lea.hbm %s1028_s2, 512 }
 0x252   : > { %p744_p4 = scmp.ne.s32.totalorder %s531_s17, %s743_s25  ;;  %p748_p9 = scmp.lt.s32.totalorder %s531_s17, %s1028_s2 }
 0x253   : > { %p749_p10 = scmp.lt.s32.totalorder %s747_s28, %s743_s25 }
 0x254   : > { %p745_p7 = pnand %p744_p4, %p846_p5 }
 0x255   : > { %p750_p11 = por %p749_p10, %p748_p9 }
 0x256   : > { %p746_p8 = pneg %p745_p7 }
 0x258   : > { %p751_p12 = pnand %p750_p11, %p746_p8 }
 0x25a   : > { %754 = shalt.err (!%p751_p12)
}
 0x25b   : > { %639 = dma.vmem_to_hbm [thread:$0]  (%p846_p5), %s988_s6, 128, %s531_s17, %s520_s21  }
 0x25c PF: > { %p645_p13 = scmp.ge.s32.totalorder %s789_s12, 2  ;;  %s545_s3 = sand.u32 1, %s777_s9  }
 0x25d   : > { %s546_s4 = scalar_lea.sflag [#allocation3], %s545_s3 }
 0x25e   : > { %p642_p0 = pnand %p645_p13, %p850_p6 }
 0x260   : > { %p643_p1 = pneg %p642_p0 }
 0x262   : > { %772 = dma.done.wait (%p643_p1), %s546_s4, 128  }
 0x263   : > { %774 = vsyncadd (%p643_p1), %s546_s4, 4294967168  ;;  %p12_p2 = scmp.ge.s32.totalorder %s833_s15, 6   ;;  %s1031_s9 = smov %s781_s10 }
 0x264   : > { %s1032_s10 = smov %s785_s11  ;;  %s1033_s11 = smov %s844_s18 }
 0x265   : > { %s1034_s12 = smov %s833_s15  ;;  %14 = sbr.rel (!%p12_p2) target bundleno = 3 (0x3), region = 66 }
 0x26a   :  { %551 = vsyncpa [#allocation3], 1 }
 0x26b   :  { %553 = vsyncpa [#allocation3 + $0x1], 1 }

</bundles_post_ra>
